<compile_context>
chip_gen: v6e
topology: v6e:2x2x1
jax: 0.10.0
libtpu: 0.0.40
codegen_flags: <defaults>
</compile_context>

<pallas_src>
import functools

import jax
import jax.numpy as jnp
from jax.experimental import pallas as pl
from jax.experimental.pallas import tpu as pltpu

# ----------------------------- configuration --------------------------------
N_QUBITS = 3
N_TOKENS = 8                   # context length (power of two, as in the module)
QSVT_DEGREE = 3
N_ANSATZ_LAYERS = 1
VOCAB = 32
EMB = 32
BATCH = 2
# dropout: eval-mode / p=0.0 -> identity (no kernel needed)

DIM = 2 ** N_QUBITS
N_PQC = 4 * N_QUBITS * N_ANSATZ_LAYERS
N_MEAS = 3 * N_QUBITS
N_COEFF = QSVT_DEGREE + 1
OUT_LANES = 128                # lane-dense packed output slab width


# ----------------------- ansatz-14 circuit construction (JAX glue) ----------
def _embed_1q(g, wire, nq):
    left = jnp.eye(2 ** wire, dtype=jnp.complex64)
    right = jnp.eye(2 ** (nq - 1 - wire), dtype=jnp.complex64)
    return jnp.kron(jnp.kron(left, g.astype(jnp.complex64)), right)


def _ry(theta):
    c = jnp.cos(theta / 2.0)
    s = jnp.sin(theta / 2.0)
    return jnp.stack([jnp.stack([c, -s]), jnp.stack([s, c])]).astype(jnp.complex64)


def _rx(theta):
    c = jnp.cos(theta / 2.0).astype(jnp.complex64)
    s = jnp.sin(theta / 2.0).astype(jnp.complex64)
    return jnp.stack([jnp.stack([c, -1j * s]), jnp.stack([-1j * s, c])])


def _crx_full(theta, control, target, nq):
    p0 = jnp.array([[1.0, 0.0], [0.0, 0.0]], jnp.complex64)
    p1 = jnp.array([[0.0, 0.0], [0.0, 1.0]], jnp.complex64)
    return (_embed_1q(p0, control, nq)
            + _embed_1q(p1, control, nq) @ _embed_1q(_rx(theta), target, nq))


def ansatz14_unitary(params, nq, layers):
    """Unitary of 'ansatz 14' (arXiv:1905.10876), torchquantum gate order/conventions.
    wire 0 = most-significant bit of the 2**nq basis index."""
    d = 2 ** nq
    u = jnp.eye(d, dtype=jnp.complex64)
    idx = 0
    for _ in range(layers):
        for i in range(nq):
            u = _embed_1q(_ry(params[idx]), i, nq) @ u
            idx += 1
        for i in range(nq - 1, -1, -1):
            u = _crx_full(params[idx], i, (i + 1) % nq, nq) @ u
            idx += 1
        for i in range(nq):
            u = _embed_1q(_ry(params[idx]), i, nq) @ u
            idx += 1
        for i in [nq - 1] + list(range(nq - 1)):
            u = _crx_full(params[idx], i, (i - 1) % nq, nq) @ u
            idx += 1
    return u


_PX = jnp.array([[0.0, 1.0], [1.0, 0.0]], jnp.complex64)
_PY = jnp.array([[0.0, -1j], [1j, 0.0]], jnp.complex64)
_PZ = jnp.array([[1.0, 0.0], [0.0, -1.0]], jnp.complex64)


def pauli_observables(nq):
    # Order matches torch reshape: [X_0..X_{nq-1}, Y_0.., Z_0..]
    ops = [_embed_1q(p, w, nq) for p in (_PX, _PY, _PZ) for w in range(nq)]
    return jnp.stack(ops)  # (3*nq, D, D)


# ------------------------------- Pallas kernels ------------------------------
def linear_kernel(x_ref, w_ref, b_ref, o_ref):
    o_ref[...] = (jnp.dot(x_ref[...], w_ref[...], preferred_element_type=jnp.float32)
                  + b_ref[...])


def pallas_linear(x, w, b):
    # single invocation: the whole problem (~2 KiB) fits VMEM; no grid overhead.
    n = x.shape[0]
    p = w.shape[1]
    return pl.pallas_call(
        linear_kernel,
        out_shape=jax.ShapeDtypeStruct((n, p), jnp.float32),
    )(x, w, b.reshape(1, p))


def quantum_core_kernel(c_ref, ut_ref, wtop_ref, wbot_ref, vt_ref, pt_ref,
                        rep_ref, sel_ref, w1_ref, b1_ref, w2_ref, b2_ref,
                        out_ref, *, vocab):
    batch = out_ref.shape[0]
    d2 = vt_ref.shape[0]            # 2 * 2**n_qubits  ([re | im] packed width)
    d = d2 // 2
    k_coeff = c_ref.shape[0]

    # ---- LCU for the whole batch: two lane-dense MXU dots.
    #      ut_ref is (B*D, T*2*D); wtop/wbot (T*2*D, 2D) carry the L1-normalized
    #      LCU coefficients folded with identity blocks, so rows b*D..b*D+D of
    #      the results are [MT_re|MT_im] and [-MT_im|MT_re] of M^T[b].
    ut = ut_ref[...]
    top_all = jnp.dot(ut, wtop_ref[...], preferred_element_type=jnp.float32)
    bot_all = jnp.dot(ut, wbot_ref[...], preferred_element_type=jnp.float32)

    # ---- QSVT polynomial on big-real row states [s_re | s_im];
    #      qsvt coefficients were pre-scaled by 1/||c||_1 in the wrapper.
    lane = jax.lax.broadcasted_iota(jnp.int32, (1, d2), 1)
    e0 = (lane == 0).astype(jnp.float32)                # |0...0>
    c0 = c_ref[0]
    mt_bigs, s_rows, acc_rows = [], [], []
    for b in range(batch):
        mt_bigs.append(jnp.concatenate(                  # (2D, 2D), aligned concat
            [top_all[b * d:(b + 1) * d, :], bot_all[b * d:(b + 1) * d, :]],
            axis=0))
        s_rows.append(e0)
        acc_rows.append(c0 * e0)
    for k in range(1, k_coeff):
        ck = c_ref[k]
        for b in range(batch):
            s_rows[b] = jnp.dot(s_rows[b], mt_bigs[b],
                                preferred_element_type=jnp.float32)
            acc_rows[b] = acc_rows[b] + ck * s_rows[b]

    # assemble the per-batch rows into one (B, 2D) block (broadcast + select)
    row_ids = jax.lax.broadcasted_iota(jnp.int32, (batch, d2), 0)
    acc = jnp.zeros((batch, d2), jnp.float32)
    for b in range(batch):
        acc = jnp.where(row_ids == b, acc_rows[b], acc)

    # ---- L2 norm + normalization (rsqrt -> EUP, off the serial VALU path)
    nsq = jnp.sum(acc * acc, axis=1, keepdims=True)      # (B, 1)
    inv_n = jax.lax.rsqrt(jnp.maximum(nsq, 1e-24))
    nrm = nsq * inv_n                                    # == ||acc||_2
    psi = acc * inv_n

    # ---- quantum feed-forward unitary (batch-shared big-real), one dot
    phi = jnp.dot(psi, vt_ref[...], preferred_element_type=jnp.float32)

    # ---- all 3*n_qubits Pauli expectations in 3 dots:
    #      w_all[b, m*2D+j] = (phi_b @ PT_big_m)[j]; phi_rep replicates phi per
    #      observable; sel does the per-observable segmented sum.
    w_all = jnp.dot(phi, pt_ref[...], preferred_element_type=jnp.float32)
    phi_rep = jnp.dot(phi, rep_ref[...], preferred_element_type=jnp.float32)
    ev = jnp.dot(phi_rep * w_all, sel_ref[...], preferred_element_type=jnp.float32)

    # ---- fused output MLP; logits (lanes [0, vocab)) and state norm (lane vocab)
    #      packed into a single lane-dense (B, 128) slab -> one unmasked store.
    h = jnp.maximum(
        jnp.dot(ev, w1_ref[...], preferred_element_type=jnp.float32) + b1_ref[...],
        0.0)
    slab = jnp.dot(h, w2_ref[...], preferred_element_type=jnp.float32) + b2_ref[...]
    out_lane = jax.lax.broadcasted_iota(jnp.int32, slab.shape, 1)
    out_ref[...] = slab + jnp.where(out_lane == vocab, nrm, 0.0)


def pallas_quantum_core(cvec, ut_pack, w_top, w_bot, vt_big, pt_all, rep, sel,
                        w1, b1, w2p, b2p, *, batch, vocab):
    vmem = pl.BlockSpec(memory_space=pltpu.MemorySpace.VMEM)
    smem = pl.BlockSpec(memory_space=pltpu.MemorySpace.SMEM)
    return pl.pallas_call(
        functools.partial(quantum_core_kernel, vocab=vocab),
        in_specs=[smem] + [vmem] * 11,
        out_specs=vmem,
        out_shape=jax.ShapeDtypeStruct((batch, w2p.shape[1]), jnp.float32),
    )(cvec, ut_pack, w_top, w_bot, vt_big, pt_all, rep, sel, w1, b1, w2p, b2p)


# ------------------------------ forward passes --------------------------------
def _build_token_unitaries(angles, nq, layers):
    fn = jax.vmap(jax.vmap(lambda p: ansatz14_unitary(p, nq, layers)))
    return fn(angles)  # (B, T, D, D) complex64


def _lcu_alpha(params, batch):
    lcu = params["lcu_re"] + 1j * params["lcu_im"]
    alpha_row = lcu / jnp.maximum(jnp.sum(jnp.abs(lcu)), 1e-12)   # L1 normalize
    return jnp.broadcast_to(alpha_row, (batch, lcu.shape[0]))


def quixer_forward_pallas(params, tokens, nq, layers, degree):
    del degree  # implied by len(qsvt_c)
    b, t = tokens.shape
    d = 2 ** nq
    d2 = 2 * d

    emb = params["emb_w"][tokens]                       # glue: gather (B,T,E)
    e = emb.shape[-1]
    p = params["w_ang"].shape[-1]
    # dropout (eval / p=0) == identity
    angles = pallas_linear(emb.reshape(b * t, e), params["w_ang"],
                           params["b_ang"]).reshape(b, t, p)

    # glue: classical simulation setup -> tiny complex unitaries per token
    u = _build_token_unitaries(angles, nq, layers)      # (B,T,D,D) complex64
    ut = jnp.swapaxes(u, -1, -2)
    ut_re = jnp.real(ut).astype(jnp.float32)
    ut_im = jnp.imag(ut).astype(jnp.float32)
    # lane-dense pack of U^T: (B*D, T*2*D); lane index = (token, re/im, column)
    ut_pack = jnp.transpose(jnp.stack([ut_re, ut_im], axis=2),
                            (0, 3, 1, 2, 4)).reshape(b * d, t * 2 * d)

    # LCU coefficient matrices (alpha is identical across the batch)
    lcu = params["lcu_re"] + 1j * params["lcu_im"]
    alpha = lcu / jnp.maximum(jnp.sum(jnp.abs(lcu)), 1e-12)
    ar = jnp.real(alpha).astype(jnp.float32)
    ai = jnp.imag(alpha).astype(jnp.float32)
    eyed = jnp.eye(d, dtype=jnp.float32)
    w_re = (jnp.stack([ar, -ai], axis=1)[:, :, None, None]
            * eyed[None, None]).reshape(t * 2 * d, d)
    w_im = (jnp.stack([ai, ar], axis=1)[:, :, None, None]
            * eyed[None, None]).reshape(t * 2 * d, d)
    w_top = jnp.concatenate([w_re, w_im], axis=1)       # ut_pack @ -> [MT_re|MT_im]
    w_bot = jnp.concatenate([-w_im, w_re], axis=1)      # ut_pack @ -> [-MT_im|MT_re]

    # QSVT coefficients pre-scaled by 1/||c||_1 (hoisted out of the kernel)
    c = params["qsvt_c"].astype(jnp.float32)
    c_scaled = c / jnp.sum(jnp.abs(c))

    # quantum feed-forward unitary as a big-real (2D, 2D) matrix
    vff = ansatz14_unitary(params["qff_params"][: 4 * nq], nq, 1)
    vt_re = jnp.real(vff).T.astype(jnp.float32)
    vt_im = jnp.imag(vff).T.astype(jnp.float32)
    vt_big = jnp.block([[vt_re, vt_im], [-vt_im, vt_re]])

    # Pauli observables packed along the lane axis: (2D, M*2D), plus the
    # replication and segmented-sum selector matrices.
    paulis = pauli_observables(nq)                      # (M, D, D) complex
    m = paulis.shape[0]
    p_re = jnp.real(paulis).astype(jnp.float32)
    p_im = jnp.imag(paulis).astype(jnp.float32)
    ptb = jnp.concatenate(
        [jnp.concatenate([p_re, -p_im], axis=2),
         jnp.concatenate([p_im, p_re], axis=2)], axis=1)         # (M, 2D, 2D)
    pt_all = jnp.transpose(ptb, (1, 0, 2)).reshape(d2, m * d2)   # (2D, M*2D)
    rep = jnp.tile(jnp.eye(d2, dtype=jnp.float32), (1, m))       # (2D, M*2D)
    sel = jnp.repeat(jnp.eye(m, dtype=jnp.float32), d2, axis=0)  # (M*2D, M)

    # output MLP weights padded to a lane-dense 128-wide slab; norm goes to lane V
    v = params["w2"].shape[1]
    assert v + 1 <= OUT_LANES
    w2p = jnp.zeros((params["w2"].shape[0], OUT_LANES), jnp.float32
                    ).at[:, :v].set(params["w2"])
    b2p = jnp.zeros((1, OUT_LANES), jnp.float32).at[0, :v].set(params["b2"])

    slab = pallas_quantum_core(
        c_scaled, ut_pack, w_top, w_bot, vt_big, pt_all, rep, sel,
        params["w1"], params["b1"].reshape(1, -1), w2p, b2p,
        batch=b, vocab=v)
    logits = slab[:, :v]
    nrm = slab[:, v]
    return logits, jnp.mean(nrm)


def quixer_forward_reference(params, tokens, nq, layers, degree):
    """Pure-JAX reference mirroring the PyTorch forward semantics."""
    b, t = tokens.shape
    d = 2 ** nq
    emb = params["emb_w"][tokens]
    angles = emb @ params["w_ang"] + params["b_ang"]
    u = _build_token_unitaries(angles, nq, layers)
    alpha = _lcu_alpha(params, b)
    m = jnp.einsum("bwij,bw->bij", u, alpha)
    c = params["qsvt_c"]
    e0 = jnp.zeros((b, d), jnp.complex64).at[:, 0].set(1.0)
    s = e0
    acc = c[0] * e0
    for k in range(1, degree + 1):
        s = jnp.einsum("bij,bj->bi", m, s)
        acc = acc + c[k] * s
    acc = acc / jnp.sum(jnp.abs(c))
    nrm = jnp.linalg.norm(acc, axis=-1)
    psi = acc / jnp.maximum(nrm, 1e-12)[:, None]
    vff = ansatz14_unitary(params["qff_params"][: 4 * nq], nq, 1)
    phi = jnp.einsum("ij,bj->bi", vff, psi)
    paulis = pauli_observables(nq)
    expv = jnp.real(jnp.einsum("bi,mij,bj->bm", jnp.conj(phi), paulis, phi))
    h = jnp.maximum(expv @ params["w1"] + params["b1"], 0.0)
    logits = h @ params["w2"] + params["b2"]
    return logits, jnp.mean(nrm)


# ------------------------------------ main -----------------------------------
def init_params(key):
    ks = jax.random.split(key, 12)
    a_emb = (6.0 / (VOCAB + EMB)) ** 0.5          # xavier_uniform
    lim_ang = 1.0 / (EMB ** 0.5)
    lim1 = 1.0 / (N_MEAS ** 0.5)
    lim2 = 1.0 / (EMB ** 0.5)
    return {
        "emb_w": jax.random.uniform(ks[0], (VOCAB, EMB), jnp.float32, -a_emb, a_emb),
        "w_ang": jax.random.uniform(ks[1], (EMB, N_PQC), jnp.float32, -lim_ang, lim_ang),
        "b_ang": jax.random.uniform(ks[2], (N_PQC,), jnp.float32, -lim_ang, lim_ang),
        "qsvt_c": jax.random.uniform(ks[3], (N_COEFF,), jnp.float32),
        "lcu_re": jax.random.uniform(ks[4], (N_TOKENS,), jnp.float32),
        "lcu_im": jax.random.uniform(ks[5], (N_TOKENS,), jnp.float32),
        "qff_params": jax.random.uniform(ks[6], (N_PQC,), jnp.float32),
        "w1": jax.random.uniform(ks[7], (N_MEAS, EMB), jnp.float32, -lim1, lim1),
        "b1": jax.random.uniform(ks[8], (EMB,), jnp.float32, -lim1, lim1),
        "w2": jax.random.uniform(ks[9], (EMB, VOCAB), jnp.float32, -lim2, lim2),
        "b2": jax.random.uniform(ks[10], (VOCAB,), jnp.float32, -lim2, lim2),
    }


if __name__ == "__main__":
    key = jax.random.PRNGKey(0)
    params = init_params(key)
    tokens = jax.random.randint(jax.random.PRNGKey(1), (BATCH, N_TOKENS), 0, VOCAB,
                                dtype=jnp.int32)

    fwd = jax.jit(lambda p, x: quixer_forward_pallas(
        p, x, N_QUBITS, N_ANSATZ_LAYERS, QSVT_DEGREE))
    logits_p, mean_p = fwd(params, tokens)
    jax.block_until_ready((logits_p, mean_p))

    logits_r, mean_r = quixer_forward_reference(
        params, tokens, N_QUBITS, N_ANSATZ_LAYERS, QSVT_DEGREE)

    assert logits_p.shape == (BATCH, VOCAB)
    assert jnp.all(jnp.isfinite(logits_p))
    assert jnp.allclose(logits_p, logits_r, rtol=5e-2, atol=5e-2), "logits mismatch"
    assert jnp.allclose(mean_p, mean_r, rtol=5e-2, atol=5e-2), "norm mismatch"

    print("KERNEL_OK")
</pallas_src>

<mosaic_0001>
module attributes {stable_mosaic.version = 11 : i64} {
  func.func @linear_kernel(%arg0: memref<16x32xf32, #tpu.memory_space<vmem>>, %arg1: memref<32x12xf32, #tpu.memory_space<vmem>>, %arg2: memref<1x12xf32, #tpu.memory_space<vmem>>, %arg3: memref<16x12xf32, #tpu.memory_space<vmem>>) attributes {dimension_semantics = [], scalar_prefetch = 0 : i64, scratch_operands = 0 : i64, tpu.core_type = #tpu.core_type<tc>} {
    %c0 = arith.constant 0 : index
    %c0_0 = arith.constant 0 : index
    %0 = vector.load %arg0[%c0, %c0_0] : memref<16x32xf32, #tpu.memory_space<vmem>>, vector<16x32xf32>
    %c0_1 = arith.constant 0 : index
    %c0_2 = arith.constant 0 : index
    %1 = vector.load %arg1[%c0_1, %c0_2] : memref<32x12xf32, #tpu.memory_space<vmem>>, vector<32x12xf32>
    %cst = arith.constant dense<0.000000e+00> : vector<16x12xf32>
    %2 = tpu.matmul %0, %1, %cst {dimension_numbers = #tpu.dot_dimension_numbers<[1], [0], [0], [1], [0, 0, 1, 1], [], []>} : vector<16x32xf32>, vector<32x12xf32>, vector<16x12xf32> -> vector<16x12xf32>
    %c0_3 = arith.constant 0 : index
    %c0_4 = arith.constant 0 : index
    %3 = vector.load %arg2[%c0_3, %c0_4] : memref<1x12xf32, #tpu.memory_space<vmem>>, vector<1x12xf32>
    %4 = vector.broadcast %3 : vector<1x12xf32> to vector<16x12xf32>
    %5 = arith.addf %2, %4 : vector<16x12xf32>
    %c0_5 = arith.constant 0 : index
    %c0_6 = arith.constant 0 : index
    %6 = vector.load %arg3[%c0_5, %c0_6] : memref<16x12xf32, #tpu.memory_space<vmem>>, vector<16x12xf32>
    tpu.vector_store %arg3[%c0_5, %c0_6], %5 {strides = array<i32>} : memref<16x12xf32, #tpu.memory_space<vmem>>, vector<16x12xf32>,
    return
  }
}

module attributes {stable_mosaic.version = 11 : i64} {
  func.func @quantum_core_kernel(%arg0: memref<4xf32, #tpu.memory_space<smem>>, %arg1: memref<16x128xf32, #tpu.memory_space<vmem>>, %arg2: memref<128x16xf32, #tpu.memory_space<vmem>>, %arg3: memref<128x16xf32, #tpu.memory_space<vmem>>, %arg4: memref<16x16xf32, #tpu.memory_space<vmem>>, %arg5: memref<16x144xf32, #tpu.memory_space<vmem>>, %arg6: memref<16x144xf32, #tpu.memory_space<vmem>>, %arg7: memref<144x9xf32, #tpu.memory_space<vmem>>, %arg8: memref<9x32xf32, #tpu.memory_space<vmem>>, %arg9: memref<1x32xf32, #tpu.memory_space<vmem>>, %arg10: memref<32x128xf32, #tpu.memory_space<vmem>>, %arg11: memref<1x128xf32, #tpu.memory_space<vmem>>, %arg12: memref<2x128xf32, #tpu.memory_space<vmem>>) attributes {dimension_semantics = [], scalar_prefetch = 0 : i64, scratch_operands = 0 : i64, tpu.core_type = #tpu.core_type<tc>} {
    %c0 = arith.constant 0 : index
    %c0_0 = arith.constant 0 : index
    %0 = vector.load %arg1[%c0, %c0_0] : memref<16x128xf32, #tpu.memory_space<vmem>>, vector<16x128xf32>
    %c0_1 = arith.constant 0 : index
    %c0_2 = arith.constant 0 : index
    %1 = vector.load %arg2[%c0_1, %c0_2] : memref<128x16xf32, #tpu.memory_space<vmem>>, vector<128x16xf32>
    %cst = arith.constant dense<0.000000e+00> : vector<16x16xf32>
    %2 = tpu.matmul %0, %1, %cst {dimension_numbers = #tpu.dot_dimension_numbers<[1], [0], [0], [1], [0, 0, 1, 1], [], []>} : vector<16x128xf32>, vector<128x16xf32>, vector<16x16xf32> -> vector<16x16xf32>
    %c0_3 = arith.constant 0 : index
    %c0_4 = arith.constant 0 : index
    %3 = vector.load %arg3[%c0_3, %c0_4] : memref<128x16xf32, #tpu.memory_space<vmem>>, vector<128x16xf32>
    %cst_5 = arith.constant dense<0.000000e+00> : vector<16x16xf32>
    %4 = tpu.matmul %0, %3, %cst_5 {dimension_numbers = #tpu.dot_dimension_numbers<[1], [0], [0], [1], [0, 0, 1, 1], [], []>} : vector<16x128xf32>, vector<128x16xf32>, vector<16x16xf32> -> vector<16x16xf32>
    %5 = tpu.iota {dimensions = array<i32: 1>} : vector<1x16xi32>
    %c0_i32 = arith.constant 0 : i32
    %6 = vector.broadcast %c0_i32 : i32 to vector<1x16xi32>
    %7 = arith.cmpi eq, %5, %6 : vector<1x16xi32>
    %8 = arith.extui %7 : vector<1x16xi1> to vector<1x16xi32>
    %9 = arith.sitofp %8 : vector<1x16xi32> to vector<1x16xf32>
    %c0_6 = arith.constant 0 : index
    %10 = memref.load %arg0[%c0_6] : memref<4xf32, #tpu.memory_space<smem>>
    %11 = vector.extract_strided_slice %2 {offsets = [0, 0], sizes = [8, 16], strides = [1, 1]} : vector<16x16xf32> to vector<8x16xf32>
    %12 = vector.extract_strided_slice %4 {offsets = [0, 0], sizes = [8, 16], strides = [1, 1]} : vector<16x16xf32> to vector<8x16xf32>
    %13 = tpu.concatenate %11, %12 in 0 : vector<8x16xf32>, vector<8x16xf32> -> vector<16x16xf32>
    %14 = vector.broadcast %10 : f32 to vector<1x16xf32>
    %15 = arith.mulf %14, %9 : vector<1x16xf32>
    %16 = vector.extract_strided_slice %2 {offsets = [8, 0], sizes = [8, 16], strides = [1, 1]} : vector<16x16xf32> to vector<8x16xf32>
    %17 = vector.extract_strided_slice %4 {offsets = [8, 0], sizes = [8, 16], strides = [1, 1]} : vector<16x16xf32> to vector<8x16xf32>
    %18 = tpu.concatenate %16, %17 in 0 : vector<8x16xf32>, vector<8x16xf32> -> vector<16x16xf32>
    %19 = vector.broadcast %10 : f32 to vector<1x16xf32>
    %20 = arith.mulf %19, %9 : vector<1x16xf32>
    %c1 = arith.constant 1 : index
    %21 = memref.load %arg0[%c1] : memref<4xf32, #tpu.memory_space<smem>>
    %cst_7 = arith.constant dense<0.000000e+00> : vector<1x16xf32>
    %22 = tpu.matmul %9, %13, %cst_7 {dimension_numbers = #tpu.dot_dimension_numbers<[1], [0], [0], [1], [0, 0, 1, 1], [], []>} : vector<1x16xf32>, vector<16x16xf32>, vector<1x16xf32> -> vector<1x16xf32>
    %23 = vector.broadcast %21 : f32 to vector<1x16xf32>
    %24 = arith.mulf %23, %22 : vector<1x16xf32>
    %25 = arith.addf %15, %24 : vector<1x16xf32>
    %cst_8 = arith.constant dense<0.000000e+00> : vector<1x16xf32>
    %26 = tpu.matmul %9, %18, %cst_8 {dimension_numbers = #tpu.dot_dimension_numbers<[1], [0], [0], [1], [0, 0, 1, 1], [], []>} : vector<1x16xf32>, vector<16x16xf32>, vector<1x16xf32> -> vector<1x16xf32>
    %27 = vector.broadcast %21 : f32 to vector<1x16xf32>
    %28 = arith.mulf %27, %26 : vector<1x16xf32>
    %29 = arith.addf %20, %28 : vector<1x16xf32>
    %c2 = arith.constant 2 : index
    %30 = memref.load %arg0[%c2] : memref<4xf32, #tpu.memory_space<smem>>
    %cst_9 = arith.constant dense<0.000000e+00> : vector<1x16xf32>
    %31 = tpu.matmul %22, %13, %cst_9 {dimension_numbers = #tpu.dot_dimension_numbers<[1], [0], [0], [1], [0, 0, 1, 1], [], []>} : vector<1x16xf32>, vector<16x16xf32>, vector<1x16xf32> -> vector<1x16xf32>
    %32 = vector.broadcast %30 : f32 to vector<1x16xf32>
    %33 = arith.mulf %32, %31 : vector<1x16xf32>
    %34 = arith.addf %25, %33 : vector<1x16xf32>
    %cst_10 = arith.constant dense<0.000000e+00> : vector<1x16xf32>
    %35 = tpu.matmul %26, %18, %cst_10 {dimension_numbers = #tpu.dot_dimension_numbers<[1], [0], [0], [1], [0, 0, 1, 1], [], []>} : vector<1x16xf32>, vector<16x16xf32>, vector<1x16xf32> -> vector<1x16xf32>
    %36 = vector.broadcast %30 : f32 to vector<1x16xf32>
    %37 = arith.mulf %36, %35 : vector<1x16xf32>
    %38 = arith.addf %29, %37 : vector<1x16xf32>
    %c3 = arith.constant 3 : index
    %39 = memref.load %arg0[%c3] : memref<4xf32, #tpu.memory_space<smem>>
    %cst_11 = arith.constant dense<0.000000e+00> : vector<1x16xf32>
    %40 = tpu.matmul %31, %13, %cst_11 {dimension_numbers = #tpu.dot_dimension_numbers<[1], [0], [0], [1], [0, 0, 1, 1], [], []>} : vector<1x16xf32>, vector<16x16xf32>, vector<1x16xf32> -> vector<1x16xf32>
    %41 = vector.broadcast %39 : f32 to vector<1x16xf32>
    %42 = arith.mulf %41, %40 : vector<1x16xf32>
    %43 = arith.addf %34, %42 : vector<1x16xf32>
    %cst_12 = arith.constant dense<0.000000e+00> : vector<1x16xf32>
    %44 = tpu.matmul %35, %18, %cst_12 {dimension_numbers = #tpu.dot_dimension_numbers<[1], [0], [0], [1], [0, 0, 1, 1], [], []>} : vector<1x16xf32>, vector<16x16xf32>, vector<1x16xf32> -> vector<1x16xf32>
    %45 = vector.broadcast %39 : f32 to vector<1x16xf32>
    %46 = arith.mulf %45, %44 : vector<1x16xf32>
    %47 = arith.addf %38, %46 : vector<1x16xf32>
    %48 = tpu.iota {dimensions = array<i32: 0>} : vector<2x16xi32>
    %cst_13 = arith.constant 0.000000e+00 : f32
    %49 = vector.broadcast %cst_13 : f32 to vector<2x16xf32>
    %c0_i32_14 = arith.constant 0 : i32
    %50 = vector.broadcast %c0_i32_14 : i32 to vector<2x16xi32>
    %51 = arith.cmpi eq, %48, %50 : vector<2x16xi32>
    %52 = vector.shape_cast %43 : vector<1x16xf32> to vector<1x16xf32>
    %53 = vector.broadcast %52 : vector<1x16xf32> to vector<2x16xf32>
    %54 = arith.select %51, %53, %49 : vector<2x16xi1>, vector<2x16xf32>
    %c1_i32 = arith.constant 1 : i32
    %55 = vector.broadcast %c1_i32 : i32 to vector<2x16xi32>
    %56 = arith.cmpi eq, %48, %55 : vector<2x16xi32>
    %57 = vector.shape_cast %47 : vector<1x16xf32> to vector<1x16xf32>
    %58 = vector.broadcast %57 : vector<1x16xf32> to vector<2x16xf32>
    %59 = arith.select %56, %58, %54 : vector<2x16xi1>, vector<2x16xf32>
    %60 = arith.mulf %59, %59 : vector<2x16xf32>
    %cst_15 = arith.constant dense<0.000000e+00> : vector<2xf32>
    %61 = vector.multi_reduction <add>, %60, %cst_15 [1] : vector<2x16xf32> to vector<2xf32>
    %62 = vector.shape_cast %61 : vector<2xf32> to vector<2x1xf32>
    %cst_16 = arith.constant 1.000000e-24 : f32
    %63 = vector.broadcast %cst_16 : f32 to vector<2x1xf32>
    %64 = arith.maximumf %62, %63 : vector<2x1xf32>
    %65 = math.rsqrt %64 : vector<2x1xf32>
    %66 = arith.mulf %62, %65 : vector<2x1xf32>
    %67 = vector.broadcast %65 : vector<2x1xf32> to vector<2x16xf32>
    %68 = arith.mulf %59, %67 : vector<2x16xf32>
    %c0_17 = arith.constant 0 : index
    %c0_18 = arith.constant 0 : index
    %69 = vector.load %arg4[%c0_17, %c0_18] : memref<16x16xf32, #tpu.memory_space<vmem>>, vector<16x16xf32>
    %cst_19 = arith.constant dense<0.000000e+00> : vector<2x16xf32>
    %70 = tpu.matmul %68, %69, %cst_19 {dimension_numbers = #tpu.dot_dimension_numbers<[1], [0], [0], [1], [0, 0, 1, 1], [], []>} : vector<2x16xf32>, vector<16x16xf32>, vector<2x16xf32> -> vector<2x16xf32>
    %c0_20 = arith.constant 0 : index
    %c0_21 = arith.constant 0 : index
    %71 = vector.load %arg5[%c0_20, %c0_21] : memref<16x144xf32, #tpu.memory_space<vmem>>, vector<16x144xf32>
    %cst_22 = arith.constant dense<0.000000e+00> : vector<2x144xf32>
    %72 = tpu.matmul %70, %71, %cst_22 {dimension_numbers = #tpu.dot_dimension_numbers<[1], [0], [0], [1], [0, 0, 1, 1], [], []>} : vector<2x16xf32>, vector<16x144xf32>, vector<2x144xf32> -> vector<2x144xf32>
    %c0_23 = arith.constant 0 : index
    %c0_24 = arith.constant 0 : index
    %73 = vector.load %arg6[%c0_23, %c0_24] : memref<16x144xf32, #tpu.memory_space<vmem>>, vector<16x144xf32>
    %cst_25 = arith.constant dense<0.000000e+00> : vector<2x144xf32>
    %74 = tpu.matmul %70, %73, %cst_25 {dimension_numbers = #tpu.dot_dimension_numbers<[1], [0], [0], [1], [0, 0, 1, 1], [], []>} : vector<2x16xf32>, vector<16x144xf32>, vector<2x144xf32> -> vector<2x144xf32>
    %75 = arith.mulf %74, %72 : vector<2x144xf32>
    %c0_26 = arith.constant 0 : index
    %c0_27 = arith.constant 0 : index
    %76 = vector.load %arg7[%c0_26, %c0_27] : memref<144x9xf32, #tpu.memory_space<vmem>>, vector<144x9xf32>
    %cst_28 = arith.constant dense<0.000000e+00> : vector<2x9xf32>
    %77 = tpu.matmul %75, %76, %cst_28 {dimension_numbers = #tpu.dot_dimension_numbers<[1], [0], [0], [1], [0, 0, 1, 1], [], []>} : vector<2x144xf32>, vector<144x9xf32>, vector<2x9xf32> -> vector<2x9xf32>
    %c0_29 = arith.constant 0 : index
    %c0_30 = arith.constant 0 : index
    %78 = vector.load %arg8[%c0_29, %c0_30] : memref<9x32xf32, #tpu.memory_space<vmem>>, vector<9x32xf32>
    %cst_31 = arith.constant dense<0.000000e+00> : vector<2x32xf32>
    %79 = tpu.matmul %77, %78, %cst_31 {dimension_numbers = #tpu.dot_dimension_numbers<[1], [0], [0], [1], [0, 0, 1, 1], [], []>} : vector<2x9xf32>, vector<9x32xf32>, vector<2x32xf32> -> vector<2x32xf32>
    %c0_32 = arith.constant 0 : index
    %c0_33 = arith.constant 0 : index
    %80 = vector.load %arg9[%c0_32, %c0_33] : memref<1x32xf32, #tpu.memory_space<vmem>>, vector<1x32xf32>
    %81 = vector.broadcast %80 : vector<1x32xf32> to vector<2x32xf32>
    %82 = arith.addf %79, %81 : vector<2x32xf32>
    %cst_34 = arith.constant 0.000000e+00 : f32
    %83 = vector.broadcast %cst_34 : f32 to vector<2x32xf32>
    %84 = arith.maximumf %82, %83 : vector<2x32xf32>
    %c0_35 = arith.constant 0 : index
    %c0_36 = arith.constant 0 : index
    %85 = vector.load %arg10[%c0_35, %c0_36] : memref<32x128xf32, #tpu.memory_space<vmem>>, vector<32x128xf32>
    %cst_37 = arith.constant dense<0.000000e+00> : vector<2x128xf32>
    %86 = tpu.matmul %84, %85, %cst_37 {dimension_numbers = #tpu.dot_dimension_numbers<[1], [0], [0], [1], [0, 0, 1, 1], [], []>} : vector<2x32xf32>, vector<32x128xf32>, vector<2x128xf32> -> vector<2x128xf32>
    %c0_38 = arith.constant 0 : index
    %c0_39 = arith.constant 0 : index
    %87 = vector.load %arg11[%c0_38, %c0_39] : memref<1x128xf32, #tpu.memory_space<vmem>>, vector<1x128xf32>
    %88 = vector.broadcast %87 : vector<1x128xf32> to vector<2x128xf32>
    %89 = arith.addf %86, %88 : vector<2x128xf32>
    %90 = tpu.iota {dimensions = array<i32: 1>} : vector<2x128xi32>
    %c32_i32 = arith.constant 32 : i32
    %91 = vector.broadcast %c32_i32 : i32 to vector<2x128xi32>
    %92 = arith.cmpi eq, %90, %91 : vector<2x128xi32>
    %cst_40 = arith.constant 0.000000e+00 : f32
    %93 = vector.shape_cast %66 : vector<2x1xf32> to vector<2x1xf32>
    %94 = vector.broadcast %93 : vector<2x1xf32> to vector<2x128xf32>
    %95 = vector.broadcast %cst_40 : f32 to vector<2x128xf32>
    %96 = arith.select %92, %94, %95 : vector<2x128xi1>, vector<2x128xf32>
    %97 = arith.addf %89, %96 : vector<2x128xf32>
    %c0_41 = arith.constant 0 : index
    %c0_42 = arith.constant 0 : index
    %98 = vector.load %arg12[%c0_41, %c0_42] : memref<2x128xf32, #tpu.memory_space<vmem>>, vector<2x128xf32>
    tpu.vector_store %arg12[%c0_41, %c0_42], %97 {strides = array<i32>} : memref<2x128xf32, #tpu.memory_space<vmem>>, vector<2x128xf32>,
    return
  }
}

</mosaic_0001>

<bundles_post_ra>
// kernel: neg.31
= control target key start
LH: loop header
LB: loop body
LE: loop exit
PB: predicated region body
PF: predicated region fallthrough
CT: control target
= control target key end

     0   :  { %s152_s0 = inlined_call_operand.vmem [shape: f32[9,8,8], index: 0, kind: input, shape index: {}]   ;;  %s153_s1 = inlined_call_operand.vmem [shape: f32[9,8,8], index: 1, kind: output, shape index: {}]  }
   0x1   :  { %v2_v0 = vld [vmem:[%s152_s0] sm:$0xff]  ;;  %v72_v1 = vld [vmem:[%s152_s0 + $0x8] sm:$0xff]  ;;  %v74_v2 = vld [vmem:[%s152_s0 + $0x10] sm:$0xff] }
   0x2   :  { %v5_v3 = vxor.u32 2147483648, %v2_v0  ;;  %v12_v4 = vxor.u32 2147483648, %v72_v1  ;;  %v20_v5 = vxor.u32 2147483648, %v74_v2  ;;  %v76_v6 = vld [vmem:[%s152_s0 + $0x18] sm:$0xff]  ;;  %v78_v7 = vld [vmem:[%s152_s0 + $0x20] sm:$0xff]  ;;  %v80_v8 = vld [vmem:[%s152_s0 + $0x28] sm:$0xff] }
   0x3   :  { %v28_v9 = vxor.u32 2147483648, %v76_v6  ;;  %v36_v10 = vxor.u32 2147483648, %v78_v7  ;;  %v44_v11 = vxor.u32 2147483648, %v80_v8  ;;  %v82_v12 = vld [vmem:[%s152_s0 + $0x30] sm:$0xff]  ;;  %v84_v13 = vld [vmem:[%s152_s0 + $0x38] sm:$0xff]  ;;  %v86_v14 = vld [vmem:[%s152_s0 + $0x40] sm:$0xff] }
   0x4   :  { %7 = vst [vmem:[%s153_s1] sm:$0xff] %v5_v3  ;;  %73 = vst [vmem:[%s153_s1 + $0x8] sm:$0xff] %v12_v4  ;;  %v52_v15 = vxor.u32 2147483648, %v82_v12  ;;  %v60_v16 = vxor.u32 2147483648, %v84_v13  ;;  %v68_v17 = vxor.u32 2147483648, %v86_v14 }
   0x5   :  { %75 = vst [vmem:[%s153_s1 + $0x10] sm:$0xff] %v20_v5  ;;  %77 = vst [vmem:[%s153_s1 + $0x18] sm:$0xff] %v28_v9 }
   0x6   :  { %79 = vst [vmem:[%s153_s1 + $0x20] sm:$0xff] %v36_v10  ;;  %81 = vst [vmem:[%s153_s1 + $0x28] sm:$0xff] %v44_v11 }
   0x7   :  { %83 = vst [vmem:[%s153_s1 + $0x30] sm:$0xff] %v52_v15  ;;  %85 = vst [vmem:[%s153_s1 + $0x38] sm:$0xff] %v60_v16 }
   0x8   :  { %87 = vst [vmem:[%s153_s1 + $0x40] sm:$0xff] %v68_v17 }

// kernel: _lambda_.2
= control target key start
LH: loop header
LB: loop body
LE: loop exit
PB: predicated region body
PF: predicated region fallthrough
CT: control target
= control target key end

     0   :  { %vm27_vm0 = vcmask 261120   ;;  %vm109_vm1 = vcmask 97280   ;;  %s185_s1 = inlined_call_operand.vmem [shape: f32[32,12], index: 1, kind: input, shape index: {}]   ;;  %s186_s0 = inlined_call_operand.vmem [shape: f32[16,32], index: 0, kind: input, shape index: {}]   ;;  %s187_s2 = inlined_call_operand.vmem [shape: f32[1,12], index: 2, kind: input, shape index: {}]   ;;  %s188_s3 = inlined_call_operand.vmem [shape: f32[16,12], index: 3, kind: output, shape index: {}]  }
   0x1   :  { %v19_v0 = vld [vmem:[%s185_s1 + $0x18] sm:$0xff]  ;;  %v18_v1 = vld [vmem:[%s185_s1 + $0x10] sm:$0xff]  ;;  %v14_v2 = vld [vmem:[%s186_s0] sm:$0xff] }
   0x2   :  { %125 = vmatprep.subr.mxu0 %v19_v0  ;;  %v17_v3 = vld [vmem:[%s185_s1 + $0x8] sm:$0xff]  ;;  %133 = vmatprep.mubr.msk.f32.mxu0 %vm27_vm0, %v14_v2  ;;  %v16_v4 = vld [vmem:[%s185_s1] sm:$0xff] }
   0x3   :  { %126 = vmatpush3.msra.mxu0 %v19_v0  ;;  %v15_v5 = vld [vmem:[%s186_s0 + $0x8] sm:$0xff]  ;;  %v116_v6 = vld [vmem:[%s187_s2] ss:$0 sm:$0xff] }
   0x4   :  { %127 = vmatprep.subr.mxu0 %v18_v1 }
   0x5   :  { %128 = vmatpush3.msra.mxu0 %v18_v1 }
   0x6   :  { %129 = vmatprep.subr.mxu0 %v17_v3 }
   0x7   :  { %130 = vmatpush3.msra.mxu0 %v17_v3 }
   0x8   :  { %131 = vmatprep.subr.mxu0 %v16_v4 }
   0x9   :  { %132 = vmatpush3.msra.mxu0 %v16_v4 }
   0xa   :  { %134 = vmatmul.mubr.msk.f32.vlgmr.msra.gmra.mxu0 %vm27_vm0, %v15_v5 }
  0xca   :  { %v135_v7 = vpop.f32.mrf.mxu0 }
  0xcb   :  { %v106_v8 = vadd.f32 %v135_v7, %v116_v6 }
  0xcc   :  { %v100_v9 = vpop.f32.mrf.mxu0 }
  0xcd   :  { %111 = vst.msk [vmem:[%s188_s3 + $0x8] sm:$0xff] %vm109_vm1, %v106_v8  ;;  %v101_v10 = vadd.f32 %v116_v6, %v100_v9 }
  0xcf   :  { %110 = vst.msk [vmem:[%s188_s3] sm:$0xff] %vm109_vm1, %v101_v10 }

// kernel: _lambda_.3
= control target key start
LH: loop header
LB: loop body
LE: loop exit
PB: predicated region body
PF: predicated region fallthrough
CT: control target
= control target key end

     0   :  { %17 = vsyncpa [#allocation3], 0  ;;  %s1828_s0 = inlined_call_operand.vmem [shape: f32[4], index: 0, kind: input, shape index: {}]   ;;  %s1829_s1 = inlined_call_operand.vmem [shape: f32[16,128], index: 1, kind: input, shape index: {}]   ;;  %s1830_s2 = inlined_call_operand.vmem [shape: f32[128,16], index: 2, kind: input, shape index: {}]   ;;  %s1831_s3 = inlined_call_operand.vmem [shape: f32[128,16], index: 3, kind: input, shape index: {}]   ;;  %s1832_s4 = inlined_call_operand.vmem [shape: f32[16,16], index: 4, kind: input, shape index: {}]   ;;  %s1833_s5 = inlined_call_operand.vmem [shape: f32[16,144], index: 5, kind: input, shape index: {}]   ;;  %s1834_s6 = inlined_call_operand.vmem [shape: f32[16,144], index: 6, kind: input, shape index: {}]   ;;  %s1835_s7 = inlined_call_operand.vmem [shape: f32[144,9], index: 7, kind: input, shape index: {}]   ;;  %s1836_s8 = inlined_call_operand.vmem [shape: f32[9,32], index: 8, kind: input, shape index: {}]   ;;  %s1837_s9 = inlined_call_operand.vmem [shape: f32[1,32], index: 9, kind: input, shape index: {}]   ;;  %s1838_s10 = inlined_call_operand.vmem [shape: f32[32,128], index: 10, kind: input, shape index: {}]   ;;  %s1839_s11 = inlined_call_operand.vmem [shape: f32[1,128], index: 11, kind: input, shape index: {}]   ;;  %s1840_s12 = inlined_call_operand.vmem [shape: f32[2,128], index: 12, kind: output, shape index: {}]  }
   0x1   :  { %s24_s23 = sshll.u32 %s1828_s0, 4  ;;  %s25_s23 = int_to_ptr.vmem [resolvable:$true] %s24_s23 }
   0x2   :  { %s1452_s24 = scalar_lea.vmem %s25_s23, 16  ;;  %p1457_p1 = scmp.lt.s32.totalorder %s25_s23, %s25_s23 }
   0x3   :  { %p1453_p0 = scmp.ne.s32.totalorder %s25_s23, %s1452_s24  ;;  %p1458_p2 = scmp.lt.s32.totalorder %s1452_s24, %s1452_s24 }
   0x5   :  { %p1459_p3 = por %p1458_p2, %p1457_p1 }
   0x7   :  { %p1460_p4 = pnand %p1459_p3, %p1453_p0 }
   0x9   :  { %1463 = shalt.err (!%p1460_p4)
}
   0xa   :  { %s1466_s25 = smov [#allocation2]  }
   0xb   :  { %27 = dma.vmem_to_smem %s25_s23, 16, %s1466_s25, [#allocation3]  }
   0xc   :  { %1464 = dma.done.wait [#allocation3], 16  }
   0xd   :  { %1465 = vsyncadd [#allocation3], 4294967280 }
   0xe   :  { %53 = sfence }
   0xf   :  { %v71_v0 = vld [vmem:[%s1830_s2 + $0x78] sm:$0xff]  ;;  %v70_v2 = vld [vmem:[%s1830_s2 + $0x70] sm:$0xff]  ;;  %v69_v4 = vld [vmem:[%s1830_s2 + $0x68] sm:$0xff]  ;;  %v1467_v34 = vmov 0.0   ;;  %vm1468_vm0 = vmmov 0   ;;  %v238_v35 = vlaneseq  ;;  %vm247_vm2 = vcmask 130048  }
  0x10   :  { %v162_v1 = vld [vmem:[%s1831_s3 + $0x78] sm:$0xff]  ;;  %1310 = vmatprep.subr.mxu0 %v71_v0  ;;  %v161_v3 = vld [vmem:[%s1831_s3 + $0x70] sm:$0xff]  ;;  %v160_v5 = vld [vmem:[%s1831_s3 + $0x68] sm:$0xff]  ;;  %s1233_s18 = sld [smem:[#allocation2 + $0x3]]  ;;  %vm715_vm5 = vcmask 123904   ;;  %vm1057_vm6 = vcmask 1040384  }
  0x11   :  { %1345 = vmatprep.subr.mxu1 %v162_v1  ;;  %1311 = vmatpush3.msra.mxu0 %v71_v0  ;;  %v68_v6 = vld [vmem:[%s1830_s2 + $0x60] sm:$0xff]  ;;  %v67_v8 = vld [vmem:[%s1830_s2 + $0x58] sm:$0xff]  ;;  %v66_v10 = vld [vmem:[%s1830_s2 + $0x50] sm:$0xff]  ;;  %v1646_v36 = vand.u32 127, %v238_v35  ;;  %v701_v63 = vshrl.u32 %v238_v35, 7  ;;  %vm1053_vm7 = vcmask 72704  }
  0x12   :  { %1346 = vmatpush3.msra.mxu1 %v162_v1  ;;  %1312 = vmatprep.subr.mxu0 %v70_v2  ;;  %v159_v7 = vld [vmem:[%s1831_s3 + $0x60] sm:$0xff]  ;;  %v158_v9 = vld [vmem:[%s1831_s3 + $0x58] sm:$0xff]  ;;  %v157_v11 = vld [vmem:[%s1831_s3 + $0x50] sm:$0xff]  ;;  %vm1143_vm8 = vcmask 261120  }
  0x13   :  { %1347 = vmatprep.subr.mxu1 %v161_v3  ;;  %1313 = vmatpush3.msra.mxu0 %v70_v2  ;;  %v65_v12 = vld [vmem:[%s1830_s2 + $0x48] sm:$0xff]  ;;  %v64_v14 = vld [vmem:[%s1830_s2 + $0x40] sm:$0xff]  ;;  %v63_v16 = vld [vmem:[%s1830_s2 + $0x38] sm:$0xff]  ;;  %vm240_vm1 = vcmp.eq.s32.totalorder %v1646_v36, 0  ;;  %v705_v2 = vsub.s32 0, %v701_v63  ;;  %vm702_vm3 = vcmp.eq.s32.totalorder %v701_v63, 0 }
  0x14   :  { %1348 = vmatpush3.msra.mxu1 %v161_v3  ;;  %1314 = vmatprep.subr.mxu0 %v69_v4  ;;  %v156_v13 = vld [vmem:[%s1831_s3 + $0x48] sm:$0xff]  ;;  %v155_v15 = vld [vmem:[%s1831_s3 + $0x40] sm:$0xff]  ;;  %v154_v17 = vld [vmem:[%s1831_s3 + $0x38] sm:$0xff]  ;;  %v1226_v40 = vsel %vm240_vm1, 1.0, %v1467_v34  ;;  %vm708_vm4 = vcmp.eq.s32.totalorder %v701_v63, 1  ;;  %vm1217_vm9 = vcmp.eq.s32.totalorder %v1646_v36, 32 }
  0x15   :  { %1349 = vmatprep.subr.mxu1 %v160_v5  ;;  %1315 = vmatpush3.msra.mxu0 %v69_v4  ;;  %v62_v18 = vld [vmem:[%s1830_s2 + $0x30] sm:$0xff]  ;;  %v61_v20 = vld [vmem:[%s1830_s2 + $0x28] sm:$0xff]  ;;  %v60_v22 = vld [vmem:[%s1830_s2 + $0x20] sm:$0xff] }
  0x16   :  { %1350 = vmatpush3.msra.mxu1 %v160_v5  ;;  %1316 = vmatprep.subr.mxu0 %v68_v6  ;;  %v153_v19 = vld [vmem:[%s1831_s3 + $0x30] sm:$0xff]  ;;  %v152_v21 = vld [vmem:[%s1831_s3 + $0x28] sm:$0xff]  ;;  %v151_v23 = vld [vmem:[%s1831_s3 + $0x20] sm:$0xff]  ;;  %v622_v62 = vstv %s1233_s18 }
  0x17   :  { %1351 = vmatprep.subr.mxu1 %v159_v7  ;;  %1317 = vmatpush3.msra.mxu0 %v68_v6  ;;  %v59_v24 = vld [vmem:[%s1830_s2 + $0x18] sm:$0xff]  ;;  %v58_v26 = vld [vmem:[%s1830_s2 + $0x10] sm:$0xff]  ;;  %v57_v28 = vld [vmem:[%s1830_s2 + $0x8] sm:$0xff] }
  0x18   :  { %1352 = vmatpush3.msra.mxu1 %v159_v7  ;;  %1318 = vmatprep.subr.mxu0 %v67_v8  ;;  %v150_v25 = vld [vmem:[%s1831_s3 + $0x18] sm:$0xff]  ;;  %v149_v27 = vld [vmem:[%s1831_s3 + $0x10] sm:$0xff]  ;;  %v148_v29 = vld [vmem:[%s1831_s3 + $0x8] sm:$0xff] }
  0x19   :  { %1353 = vmatprep.subr.mxu1 %v158_v9  ;;  %1319 = vmatpush3.msra.mxu0 %v67_v8  ;;  %v56_v30 = vld [vmem:[%s1830_s2] sm:$0xff]  ;;  %v55_v33 = vld [vmem:[%s1829_s1 + $0x8] sm:$0xff]  ;;  %s1227_s2 = sld [smem:[#allocation2 + $0x1]]  ;;  %v1134_v63 = vld [vmem:[%s1838_s10 + $0x10] sm:$0xff] }
  0x1a   :  { %1354 = vmatpush3.msra.mxu1 %v158_v9  ;;  %1320 = vmatprep.subr.mxu0 %v66_v10  ;;  %v147_v31 = vld [vmem:[%s1831_s3] sm:$0xff]  ;;  %s1230_s3 = sld [smem:[#allocation2 + $0x2]]  ;;  %v966_v35 = vld [vmem:[%s1835_s7 + $0x68] sm:$0xff] }
  0x1b   :  { %1355 = vmatprep.subr.mxu1 %v157_v11  ;;  %1321 = vmatpush3.msra.mxu0 %v66_v10  ;;  %v54_v32 = vld [vmem:[%s1829_s1] sm:$0xff]  ;;  %s243_s1 = sld [smem:[#allocation2]] }
  0x1c   :  { %1356 = vmatpush3.msra.mxu1 %v157_v11  ;;  %1322 = vmatprep.subr.mxu0 %v65_v12 }
  0x1d   :  { %1357 = vmatprep.subr.mxu1 %v156_v13  ;;  %1323 = vmatpush3.msra.mxu0 %v65_v12 }
  0x1e   :  { %1358 = vmatpush3.msra.mxu1 %v156_v13  ;;  %1324 = vmatprep.subr.mxu0 %v64_v14 }
  0x1f   :  { %1359 = vmatprep.subr.mxu1 %v155_v15  ;;  %1325 = vmatpush3.msra.mxu0 %v64_v14  ;;  %v321_v47 = vstv %s1227_s2 }
  0x20   :  { %1360 = vmatpush3.msra.mxu1 %v155_v15  ;;  %1326 = vmatprep.subr.mxu0 %v63_v16  ;;  %v470_v50 = vstv %s1230_s3  ;;  %v724_v15 = vld [vmem:[%s1832_s4 + $0x8] sm:$0xff] }
  0x21   :  { %1361 = vmatprep.subr.mxu1 %v154_v17  ;;  %1327 = vmatpush3.msra.mxu0 %v63_v16  ;;  %v244_v46 = vstv %s243_s1  ;;  %v723_v16 = vld [vmem:[%s1832_s4] sm:$0xff] }
  0x22   :  { %1362 = vmatpush3.msra.mxu1 %v154_v17  ;;  %1328 = vmatprep.subr.mxu0 %v62_v18  ;;  %v245_v48 = vmul.f32 %v1226_v40, %v244_v46  ;;  %v801_v17 = vld [vmem:[%s1833_s5 + $0x18] sm:$0xff] }
  0x23   :  { %1363 = vmatprep.subr.mxu1 %v153_v19  ;;  %1329 = vmatpush3.msra.mxu0 %v62_v18  ;;  %v879_v18 = vld [vmem:[%s1834_s6 + $0x18] sm:$0xff] }
  0x24   :  { %1364 = vmatpush3.msra.mxu1 %v153_v19  ;;  %1330 = vmatprep.subr.mxu0 %v61_v20  ;;  %v800_v19 = vld [vmem:[%s1833_s5 + $0x10] sm:$0xff]  ;;  %v956_v46 = vld [vmem:[%s1835_s7 + $0x18] sm:$0xff] }
  0x25   :  { %1365 = vmatprep.subr.mxu1 %v152_v21  ;;  %1331 = vmatpush3.msra.mxu0 %v61_v20  ;;  %v799_v20 = vld [vmem:[%s1833_s5 + $0x8] sm:$0xff] }
  0x26   :  { %1366 = vmatpush3.msra.mxu1 %v152_v21  ;;  %1332 = vmatprep.subr.mxu0 %v60_v22 }
  0x27   :  { %1367 = vmatprep.subr.mxu1 %v151_v23  ;;  %1333 = vmatpush3.msra.mxu0 %v60_v22 }
  0x28   :  { %1368 = vmatpush3.msra.mxu1 %v151_v23  ;;  %1334 = vmatprep.subr.mxu0 %v59_v24 }
  0x29   :  { %1369 = vmatprep.subr.mxu1 %v150_v25  ;;  %1335 = vmatpush3.msra.mxu0 %v59_v24 }
  0x2a   :  { %1370 = vmatpush3.msra.mxu1 %v150_v25  ;;  %1336 = vmatprep.subr.mxu0 %v58_v26 }
  0x2b   :  { %1371 = vmatprep.subr.mxu1 %v149_v27  ;;  %1337 = vmatpush3.msra.mxu0 %v58_v26  ;;  %v878_v26 = vld [vmem:[%s1834_s6 + $0x10] sm:$0xff] }
  0x2c   :  { %1372 = vmatpush3.msra.mxu1 %v149_v27  ;;  %1338 = vmatprep.subr.mxu0 %v57_v28  ;;  %v877_v27 = vld [vmem:[%s1834_s6 + $0x8] sm:$0xff] }
  0x2d   :  { %1373 = vmatprep.subr.mxu1 %v148_v29  ;;  %1339 = vmatpush3.msra.mxu0 %v57_v28  ;;  %v798_v28 = vld [vmem:[%s1833_s5] sm:$0xff] }
  0x2e   :  { %1374 = vmatpush3.msra.mxu1 %v148_v29  ;;  %1340 = vmatprep.subr.mxu0 %v56_v30  ;;  %v876_v29 = vld [vmem:[%s1834_s6] sm:$0xff] }
  0x2f   :  { %1375 = vmatprep.subr.mxu1 %v147_v31  ;;  %1341 = vmatpush3.msra.mxu0 %v56_v30  ;;  %v968_v30 = vld [vmem:[%s1835_s7 + $0x78] sm:$0xff] }
  0x30   :  { %1342 = vmatprep.mubr.f32.mxu0 %v54_v32  ;;  %1376 = vmatpush3.msra.mxu1 %v147_v31 }
  0x31   :  { %1377 = vmatprep.mubr.f32.mxu1 %v54_v32  ;;  %1343 = vmatmul.mubr.f32.vlgmr.msra.gmra.mxu0 %v55_v33  ;;  %v967_v32 = vld [vmem:[%s1835_s7 + $0x70] sm:$0xff] }
  0x32   :  { %1378 = vmatmul.mubr.f32.vlgmr.msra.gmra.mxu1 %v55_v33  ;;  %1415 = vmatprep.subr.mxu1 %v1467_v34 }
  0x33   :  { %1380 = vmatprep.subr.mxu0 %v1467_v34  ;;  %1384 = vmatprep.mubr.msk.f32.mxu0 %vm1468_vm0, %v1467_v34 }
  0x34   :  { %1419 = vmatprep.mubr.msk.f32.mxu1 %vm1468_vm0, %v1467_v34 }
  0xf1   :  { %v1344_v37 = vpop.f32.mrf.mxu0 }
  0xf2   :  { %v1379_v38 = vpop.f32.mrf.mxu1 }
  0xf3   :  { %1416 = vmatpush3.msra.mxu1 %v1379_v38  ;;  %v138_v41 = vpop.f32.mrf.mxu0 }
  0xf4   :  { %v229_v39 = vpop.f32.mrf.mxu1  ;;  %1417 = vmatprep.subr.mxu1 %v1467_v34 }
  0xf5   :  { %1381 = vmatpush3.msra.mxu0 %v229_v39  ;;  %1418 = vmatpush3.msra.mxu1 %v1344_v37 }
  0xf6   :  { %1382 = vmatprep.subr.mxu0 %v1467_v34  ;;  %833 = vmatprep.subr.mxu1 %v801_v17 }
  0xf7   :  { %1383 = vmatpush3.msra.mxu0 %v138_v41 }
  0xf8   :  { %1385 = vmatmul.mubr.msk.f32.vlgmr.msra.gmra.mxu0 %vm247_vm2, %v1226_v40  ;;  %1387 = vmatprep.subr.mxu0 %v1467_v34 }
  0xf9   :  { %1388 = vmatpush3.msra.mxu0 %v1379_v38  ;;  %1391 = vmatprep.mubr.msk.f32.mxu0 %vm1468_vm0, %v1467_v34 }
  0xfa   :  { %1389 = vmatprep.subr.mxu0 %v1467_v34 }
  0xfb   :  { %1390 = vmatpush3.msra.mxu0 %v1344_v37 }
  0xfc   :  { %1392 = vmatmul.mubr.msk.f32.vlgmr.msra.gmra.mxu0 %vm247_vm2, %v1226_v40  ;;  %1394 = vmatprep.subr.mxu0 %v1467_v34  ;;  %v962_v40 = vld [vmem:[%s1835_s7 + $0x48] sm:$0xff] }
  0xfd   :  { %1395 = vmatpush3.msra.mxu0 %v229_v39  ;;  %1398 = vmatprep.mubr.msk.f32.mxu0 %vm1468_vm0, %v1467_v34 }
  0xfe   :  { %1396 = vmatprep.subr.mxu0 %v1467_v34 }
  0xff   :  { %1397 = vmatpush3.msra.mxu0 %v138_v41 }
 0x100   :  { %1401 = vmatprep.subr.mxu0 %v1467_v34 }
 0x1b8   :  { %v317_v42 = vpop.f32.mrf.mxu0 }
 0x1b9   :  { %1399 = vmatmul.mubr.msk.f32.vlgmr.msra.gmra.mxu0 %vm247_vm2, %v317_v42  ;;  %v322_v49 = vmul.f32 %v321_v47, %v317_v42  ;;  %v960_v42 = vld [vmem:[%s1835_s7 + $0x38] sm:$0xff] }
 0x1ba   :  { %1402 = vmatpush3.msra.mxu0 %v1379_v38  ;;  %v1386_v43 = vpop.f32.mrf.mxu0  ;;  %1405 = vmatprep.mubr.msk.f32.mxu0 %vm1468_vm0, %v1467_v34  ;;  %v964_v38 = vld [vmem:[%s1835_s7 + $0x58] sm:$0xff] }
 0x1bb   :  { %1403 = vmatprep.subr.mxu0 %v1467_v34  ;;  %v323_v52 = vadd.f32 %v322_v49, %v245_v48  ;;  %v959_v43 = vld [vmem:[%s1835_s7 + $0x30] sm:$0xff]  ;;  %v953_v49 = vld [vmem:[%s1835_s7] sm:$0xff] }
 0x1bc   :  { %1404 = vmatpush3.msra.mxu0 %v1344_v37  ;;  %v390_v44 = vpop.f32.mrf.mxu0  ;;  %v965_v37 = vld [vmem:[%s1835_s7 + $0x60] sm:$0xff] }
 0x1bd   :  { %1408 = vmatprep.subr.mxu0 %v1467_v34  ;;  %1406 = vmatmul.mubr.msk.f32.vlgmr.msra.gmra.mxu0 %vm247_vm2, %v390_v44  ;;  %v394_v53 = vmul.f32 %v390_v44, %v321_v47  ;;  %v958_v44 = vld [vmem:[%s1835_s7 + $0x28] sm:$0xff]  ;;  %v955_v47 = vld [vmem:[%s1835_s7 + $0x10] sm:$0xff] }
 0x1be   :  { %1409 = vmatpush3.msra.mxu0 %v229_v39  ;;  %v1393_v45 = vpop.f32.mrf.mxu0  ;;  %1412 = vmatprep.mubr.msk.f32.mxu0 %vm1468_vm0, %v1467_v34  ;;  %v963_v39 = vld [vmem:[%s1835_s7 + $0x50] sm:$0xff] }
 0x1bf   :  { %1410 = vmatprep.subr.mxu0 %v1467_v34  ;;  %v395_v58 = vadd.f32 %v394_v53, %v245_v48  ;;  %v957_v45 = vld [vmem:[%s1835_s7 + $0x20] sm:$0xff]  ;;  %v954_v48 = vld [vmem:[%s1835_s7 + $0x8] sm:$0xff] }
 0x1c0   :  { %1411 = vmatpush3.msra.mxu0 %v138_v41  ;;  %v961_v41 = vld [vmem:[%s1835_s7 + $0x40] sm:$0xff] }
 0x1c1   :  { %1422 = vmatprep.subr.mxu0 %v1467_v34 }
 0x279   :  { %v466_v51 = vpop.f32.mrf.mxu0 }
 0x27a   :  { %v471_v54 = vmul.f32 %v470_v50, %v466_v51  ;;  %1413 = vmatmul.mubr.msk.f32.vlgmr.msra.gmra.mxu0 %vm247_vm2, %v466_v51  ;;  %v969_v51 = vld [vmem:[%s1835_s7 + $0x80] sm:$0xff] }
 0x27b   :  { %v1400_v55 = vpop.f32.mrf.mxu0  ;;  %1426 = vmatprep.mubr.msk.f32.mxu0 %vm1468_vm0, %v1467_v34  ;;  %1423 = vmatpush3.msra.mxu0 %v724_v15 }
 0x27c   :  { %v472_v56 = vadd.f32 %v471_v54, %v323_v52  ;;  %1424 = vmatprep.subr.mxu0 %v1467_v34  ;;  %v1045_v52 = vld [vmem:[%s1836_s8 + $0x8] sm:$0x1] }
 0x27d   :  { %v542_v57 = vpop.f32.mrf.mxu0  ;;  %1425 = vmatpush3.msra.mxu0 %v723_v16 }
 0x27e   :  { %v546_v59 = vmul.f32 %v542_v57, %v470_v50  ;;  %1420 = vmatmul.mubr.msk.f32.vlgmr.msra.gmra.mxu1 %vm247_vm2, %v542_v57  ;;  %908 = vmatprep.subr.mxu0 %v879_v18  ;;  %v970_v50 = vld [vmem:[%s1835_s7 + $0x88] sm:$0xff] }
 0x27f   :  { %v1407_v60 = vpop.f32.mrf.mxu0  ;;  %869 = vmatprep.mubr.f32.mxu1 %v1467_v34  ;;  %834 = vmatpush1.msra.mxu1 %v800_v19 }
 0x280   :  { %v547_v61 = vadd.f32 %v546_v59, %v395_v58  ;;  %835 = vmatprep.subr.mxu1 %v799_v20  ;;  %v1044_v59 = vld [vmem:[%s1836_s8] sm:$0xff]  ;;  %v1135_v60 = vld [vmem:[%s1838_s10 + $0x18] sm:$0xff] }
 0x281   :  { %836 = vmatpush1.msra.mxu1 %v798_v28 }
 0x282   :  { %974 = vmatprep.subr.mxu1 %v1467_v34 }
 0x33a   :  { %v618_v0 = vpop.f32.mrf.mxu0 }
 0x33b   :  { %v623_v1 = vmul.f32 %v622_v62, %v618_v0  ;;  %v1133_v0 = vld [vmem:[%s1838_s10 + $0x8] sm:$0xff] }
 0x33c   :  { %v1414_v3 = vpop.f32.mrf.mxu0 }
 0x33d   :  { %v624_v4 = vadd.f32 %v623_v1, %v472_v56  ;;  %v1132_v1 = vld [vmem:[%s1838_s10] sm:$0xff] }
 0x33e   :  { %v694_v5 = vpop.f32.mrf.mxu1 }
 0x33f   :  { %v698_v6 = vmul.f32 %v694_v5, %v622_v62  ;;  %v706_v7 = vrot.slane %v624_v4, %v705_v2 }
 0x340   :  { %v1421_v8 = vpop.f32.mrf.mxu1 }
 0x341   :  { %v699_v9 = vadd.f32 %v698_v6, %v547_v61  ;;  %v707_v11 = vsel %vm702_vm3, %v706_v7, 0.0  ;;  %v1243_v7 = vld [vmem:[%s1839_s11] ss:$0 sm:$0xff] }
 0x343   :  { %v712_v10 = vrot.slane %v699_v9, %v705_v2  ;;  %v1240_v2 = vld [vmem:[%s1837_s9] ss:$0 sm:$0xff] }
 0x345   :  { %v713_v12 = vsel %vm708_vm4, %v712_v10, %v707_v11 }
 0x346   :  { %v714_v13 = vmul.f32 %v713_v12, %v713_v12 }
 0x348   :  { %v716_v14 = vsel %vm715_vm5, %v714_v13, 0.0 }
 0x349   :  { %717 = vadd.xlane.f32.xlu0 %v716_v14 }
 0x3d2   :  { %v718_v21 = vpop.xlane.xlu0 %717 }
 0x3d3   :  { %v719_v22 = vmax.f32 %v718_v21, 1e-24 }
 0x3d5   :  { %1450 = vrsqrt.f32 %v719_v22 }
 0x3e2   :  { %v1451_v23 = vpop.eup %1450 }
 0x3e3   :  { %v1698_v24 = vmul.f32 %v1451_v23, %v718_v21  ;;  %v722_v25 = vmul.f32 %v1451_v23, %v713_v12 }
 0x3e5   :  { %1427 = vmatmul.mubr.msk.f32.vlgmr.msra.gmra.mxu0 %vm247_vm2, %v722_v25 }
 0x3e6   :  { %909 = vmatpush1.msra.mxu0 %v878_v26  ;;  %944 = vmatprep.mubr.f32.mxu0 %v1467_v34 }
 0x3e7   :  { %910 = vmatprep.subr.mxu0 %v877_v27 }
 0x3e8   :  { %911 = vmatpush1.msra.mxu0 %v876_v29 }
 0x3e9   :  { %1429 = vmatprep.subr.mxu0 %v1467_v34 }
 0x4a5   :  { %v794_v31 = vpop.f32.mrf.mxu0 }
 0x4a6   :  { %1237 = vmatmul.mubr.msk.f32.vlgmr.msra.gmra.mxu1 %vm247_vm2, %v794_v31  ;;  %1238 = vmatmul.mubr.msk.f32.vlgmr.msra.gmra.mxu0 %vm247_vm2, %v794_v31 }
 0x4a7   :  { %v1428_v33 = vpop.f32.mrf.mxu0  ;;  %975 = vmatpush1.msra.mxu1 %v968_v30  ;;  %1433 = vmatprep.mubr.msk.f32.mxu0 %vm1468_vm0, %v1467_v34 }
 0x4a8   :  { %976 = vmatprep.subr.mxu1 %v1467_v34  ;;  %1430 = vmatpush3.msk.msra.mxu0 %vm1057_vm6, %v1045_v52 }
 0x4a9   :  { %977 = vmatpush1.msra.mxu1 %v967_v32  ;;  %1431 = vmatprep.subr.mxu0 %v1467_v34 }
 0x4aa   :  { %978 = vmatprep.subr.mxu1 %v1467_v34  ;;  %1432 = vmatpush3.msra.mxu0 %v1044_v59 }
 0x4ab   :  { %979 = vmatpush1.msra.mxu1 %v966_v35  ;;  %1436 = vmatprep.subr.mxu0 %v1467_v34 }
 0x4ac   :  { %980 = vmatprep.subr.mxu1 %v1467_v34 }
 0x4ad   :  { %981 = vmatpush1.msra.mxu1 %v965_v37 }
 0x4ae   :  { %982 = vmatprep.subr.mxu1 %v1467_v34 }
 0x4af   :  { %983 = vmatpush1.msra.mxu1 %v964_v38 }
 0x4b0   :  { %984 = vmatprep.subr.mxu1 %v1467_v34 }
 0x4b1   :  { %985 = vmatpush1.msra.mxu1 %v963_v39 }
 0x4b2   :  { %986 = vmatprep.subr.mxu1 %v1467_v34 }
 0x4b3   :  { %987 = vmatpush1.msra.mxu1 %v962_v40 }
 0x4b4   :  { %988 = vmatprep.subr.mxu1 %v1467_v34 }
 0x4b5   :  { %989 = vmatpush1.msra.mxu1 %v961_v41 }
 0x4b6   :  { %990 = vmatprep.subr.mxu1 %v1467_v34 }
 0x4b7   :  { %991 = vmatpush1.msra.mxu1 %v960_v42 }
 0x4b8   :  { %992 = vmatprep.subr.mxu1 %v1467_v34 }
 0x4b9   :  { %993 = vmatpush1.msra.mxu1 %v959_v43 }
 0x4ba   :  { %994 = vmatprep.subr.mxu1 %v1467_v34 }
 0x4bb   :  { %995 = vmatpush1.msra.mxu1 %v958_v44 }
 0x4bc   :  { %996 = vmatprep.subr.mxu1 %v1467_v34 }
 0x4bd   :  { %997 = vmatpush1.msra.mxu1 %v957_v45 }
 0x4be   :  { %998 = vmatprep.subr.mxu1 %v1467_v34 }
 0x4bf   :  { %999 = vmatpush1.msra.mxu1 %v956_v46 }
 0x4c0   :  { %1000 = vmatprep.subr.mxu1 %v1467_v34 }
 0x4c1   :  { %1001 = vmatpush1.msra.mxu1 %v955_v47 }
 0x4c2   :  { %1002 = vmatprep.subr.mxu1 %v1467_v34 }
 0x4c3   :  { %1003 = vmatpush1.msra.mxu1 %v954_v48 }
 0x4c4   :  { %1004 = vmatprep.subr.mxu1 %v1467_v34 }
 0x4c5   :  { %1005 = vmatpush1.msra.mxu1 %v953_v49 }
 0x4c6   :  { %1034 = vmatprep.subr.mxu1 %v1467_v34 }
 0x4c7   :  { %1035 = vmatpush2.msra.mxu1 %v970_v50 }
 0x4c8   :  { %1036 = vmatprep.subr.mxu1 %v1467_v34 }
 0x4c9   :  { %1037 = vmatpush2.msra.mxu1 %v969_v51 }
 0x566   :  { %v871_v53 = vpop.f32.mrf.mxu1  ;;  %v946_v54 = vpop.f32.mrf.mxu0 }
 0x567   :  { %v951_v58 = vmul.f32 %v946_v54, %v871_v53 }
 0x568   :  { %v873_v55 = vpop.f32.mrf.mxu1  ;;  %v948_v56 = vpop.f32.mrf.mxu0 }
 0x569   :  { %v952_v57 = vmul.f32 %v948_v56, %v873_v55 }
 0x56b   :  { %1239 = vmatprep.mubr.msk.f32.mxu1 %vm247_vm2, %v952_v57 }
 0x56c   :  { %1039 = vmatmul.mubr.f32.vlgmr.msra.gmra.mxu1 %v951_v58 }
 0x62c   :  { %v1040_v61 = vpop.f32.mrf.mxu1 }
 0x62d   :  { %1434 = vmatmul.mubr.msk.f32.vlgmr.msra.gmra.mxu0 %vm1053_vm7, %v1040_v61 }
 0x62e   :  { %v1042_v62 = vpop.f32.mrf.mxu1  ;;  %1437 = vmatpush3.msra.mxu0 %v1135_v60  ;;  %1444 = vmatprep.mubr.msk.f32.mxu0 %vm1468_vm0, %v1467_v34 }
 0x62f   :  { %1438 = vmatprep.subr.mxu0 %v1467_v34 }
 0x630   :  { %1439 = vmatpush3.msra.mxu0 %v1134_v63 }
 0x631   :  { %1440 = vmatprep.subr.mxu0 %v1467_v34 }
 0x632   :  { %1441 = vmatpush3.msra.mxu0 %v1133_v0 }
 0x633   :  { %1442 = vmatprep.subr.mxu0 %v1467_v34  ;;  %v1218_v34 = vsel %vm1217_vm9, %v1698_v24, 0.0 }
 0x634   :  { %1443 = vmatpush3.msra.mxu0 %v1132_v1 }
 0x6ed   :  { %v1127_v3 = vpop.f32.mrf.mxu0 }
 0x6ee   :  { %v1128_v4 = vadd.f32 %v1240_v2, %v1127_v3 }
 0x6ef   :  { %v1435_v5 = vpop.f32.mrf.mxu0 }
 0x6f0   :  { %v1131_v6 = vmax.f32 %v1128_v4, 0.0 }
 0x6f2   :  { %1445 = vmatmul.mubr.msk.f32.vlgmr.msra.gmra.mxu0 %vm1143_vm8, %v1131_v6 }
 0x7b2   :  { %v1213_v8 = vpop.f32.mrf.mxu0 }
 0x7b3   :  { %v1214_v9 = vadd.f32 %v1243_v7, %v1213_v8 }
 0x7b4   :  { %v1446_v10 = vpop.f32.mrf.mxu0 }
 0x7b5   :  { %v1219_v11 = vadd.f32 %v1218_v34, %v1214_v9 }
 0x7b7   :  { %1220 = vst [vmem:[%s1840_s12] sm:$0x3] %v1219_v11 }
 0x7b8   :  { %1225 = vsyncpa [#allocation3], 1 }

</bundles_post_ra>
